<compile_context>
chip_gen: v7x
topology: tpu7x:2x2x1
jax: 0.10.0
libtpu: 0.0.40
codegen_flags: <defaults>
</compile_context>

<pallas_src>
import functools

import jax
import jax.numpy as jnp
from jax import lax
from jax.experimental import pallas as pl
from jax.experimental.pallas import tpu as pltpu


# ---------------------------------------------------------------------------
# Helpers
# ---------------------------------------------------------------------------

def _round_up(n, m):
    return ((n + m - 1) // m) * m


def _cdiv(a, b):
    return (a + b - 1) // b


def _vmem_capacity_bytes():
    """Per-TensorCore VMEM capacity; conservative 64 MiB (v7x) fallback."""
    try:
        cap = int(pltpu.get_tpu_info().vmem_capacity_bytes)
        if cap > 0:
            return cap
    except Exception:
        pass
    return 64 << 20


def _vmem_limit(needed_bytes, cap):
    """Exact working set + compiler-scratch headroom, kept below capacity."""
    return int(min(int(0.9 * cap), max(int(needed_bytes) + (8 << 20), 32 << 20)))


def _resident_spec(block_shape, index_map):
    """BlockSpec for a block with a constant index_map (resident across grid
    steps): single-buffer it so it does not pay 2x VMEM."""
    try:
        return pl.BlockSpec(block_shape, index_map, pipeline_mode=pl.Buffered(1))
    except (TypeError, AttributeError):
        return pl.BlockSpec(block_shape, index_map)


def _pick_batch_tile(B, target):
    """Batch tile minimizing padding (rounded to 8 sublanes); gives the
    batch-parallel axis >= 2 grid steps (megacore) when the batch is large."""
    nt = max(1, _cdiv(B, target))
    if nt == 1 and B >= 64:
        nt = 2
    TB = _round_up(_cdiv(B, nt), 8)
    Bp = _round_up(B, TB)
    return TB, Bp


def _pick_f_tile(Fp, Mp, TB, x_bytes, cap):
    """Largest multiple-of-128 divisor of Fp whose tiled working set fits."""
    budget = int(0.7 * cap)
    for tf in range(Fp, 127, -128):
        if Fp % tf:
            continue
        need = (2 * Mp * tf * 2 + 2 * TB * tf * x_bytes
                + 2 * TB * tf * 4 + 4 * TB * Mp * 4)
        if need <= budget:
            return tf
    return 128


# ---------------------------------------------------------------------------
# In-kernel math (f32)
# ---------------------------------------------------------------------------

def _softmax_shrink(logits, shrink_thres, valid_m):
    """Softmax over the memory dim, masking padded slots, then the optional
    hard-shrink + L1 renormalization."""
    mp = logits.shape[-1]
    if valid_m < mp:
        col = lax.broadcasted_iota(jnp.int32, logits.shape, 1)
        logits = jnp.where(col < valid_m, logits, jnp.float32(-1e30))

    m = jnp.max(logits, axis=-1, keepdims=True)
    e = jnp.exp(logits - m)
    denom = jnp.sum(e, axis=-1, keepdims=True)
    att = e * pl.reciprocal(denom, approx=True)        # EUP reciprocal

    if shrink_thres > 0.0:
        # hard_shrink_relu(a) = relu(a-t)*a/(|a-t|+1e-12) == (a if a > t else 0)
        # up to O(1e-12); select frees VALU slots vs a full-precision divide.
        att = jnp.where(att > shrink_thres, att, 0.0)
        l1 = jnp.sum(att, axis=-1, keepdims=True)      # att >= 0
        att = att * pl.reciprocal(jnp.maximum(l1, 1e-12), approx=True)
    return att


# ---------------------------------------------------------------------------
# Kernels
# ---------------------------------------------------------------------------

def _fused_kernel(x_ref, w_ref, out_ref, att_ref, *, shrink_thres, valid_m):
    """Single-call path: whole (Mp, Fp) weight resident in VMEM."""
    x = x_ref[...].astype(jnp.bfloat16)     # no-op if x already bf16
    w = w_ref[...]                          # (Mp, Fp) bf16, resident

    # att_weight = x @ W^T: contract the last dims of both operands on the MXU
    # directly (no materialized transpose of the resident weight).
    logits = lax.dot_general(
        x, w, dimension_numbers=(((1,), (1,)), ((), ())),
        preferred_element_type=jnp.float32)             # (TB, Mp) f32

    att = _softmax_shrink(logits, shrink_thres, valid_m)
    att_ref[...] = att.astype(att_ref.dtype)

    # output = att @ W (bf16 MXU operands, f32 accumulation).
    out_ref[...] = jnp.dot(att.astype(w.dtype), w,
                           preferred_element_type=jnp.float32
                           ).astype(out_ref.dtype)


def _att_kernel(x_ref, w_ref, att_ref, acc_ref, *, shrink_thres, valid_m):
    """F-tiled pass 1: accumulate logits over F tiles, epilogue -> att."""
    f = pl.program_id(1)

    @pl.when(f == 0)
    def _():
        acc_ref[...] = jnp.zeros_like(acc_ref)

    acc_ref[...] += lax.dot_general(
        x_ref[...].astype(jnp.bfloat16), w_ref[...],
        dimension_numbers=(((1,), (1,)), ((), ())),
        preferred_element_type=jnp.float32)

    @pl.when(f == pl.num_programs(1) - 1)
    def _():
        att_ref[...] = _softmax_shrink(acc_ref[...], shrink_thres, valid_m
                                       ).astype(att_ref.dtype)


def _recon_kernel(att_ref, w_ref, out_ref):
    """F-tiled pass 2: out[:, f_tile] = att @ W[:, f_tile]."""
    out_ref[...] = jnp.dot(att_ref[...].astype(jnp.bfloat16), w_ref[...],
                           preferred_element_type=jnp.float32
                           ).astype(out_ref.dtype)


# ---------------------------------------------------------------------------
# pallas_call wrappers
# ---------------------------------------------------------------------------

def _fused_call(x2d, w_p, TB, out_dtype, shrink_thres, valid_m, cap, needed):
    Bp, Fp = x2d.shape
    Mp, _ = w_p.shape

    kernel = functools.partial(_fused_kernel,
                               shrink_thres=float(shrink_thres),
                               valid_m=int(valid_m))
    x_bytes = jnp.dtype(x2d.dtype).itemsize
    out_bytes = jnp.dtype(out_dtype).itemsize
    bytes_accessed = int(Bp * Fp * x_bytes + Mp * Fp * 2
                         + Bp * Fp * out_bytes + Bp * Mp * 4)

    return pl.pallas_call(
        kernel,
        out_shape=(jax.ShapeDtypeStruct((Bp, Fp), out_dtype),
                   jax.ShapeDtypeStruct((Bp, Mp), jnp.float32)),
        grid_spec=pltpu.PrefetchScalarGridSpec(
            num_scalar_prefetch=0,
            grid=(Bp // TB,),
            in_specs=[
                pl.BlockSpec((TB, Fp), lambda i: (i, 0)),    # x tile, pipelined
                _resident_spec((Mp, Fp), lambda i: (0, 0)),  # weight, 1 buffer
            ],
            out_specs=[
                pl.BlockSpec((TB, Fp), lambda i: (i, 0)),    # out tile
                pl.BlockSpec((TB, Mp), lambda i: (i, 0)),    # att tile
            ],
        ),
        compiler_params=pltpu.CompilerParams(
            dimension_semantics=("parallel",),
            vmem_limit_bytes=_vmem_limit(needed, cap)),
        cost_estimate=pl.CostEstimate(
            flops=int(2 * 2 * Bp * Mp * Fp),
            transcendentals=int(Bp * Mp),
            bytes_accessed=bytes_accessed),
    )(x2d, w_p)


def _tiled_call(x2d, w_p, TB, out_dtype, shrink_thres, valid_m, cap, f_tile):
    """Two-pass F-tiled path for weights too large to keep resident."""
    Bp, Fp = x2d.shape
    Mp, _ = w_p.shape
    x_bytes = jnp.dtype(x2d.dtype).itemsize
    out_bytes = jnp.dtype(out_dtype).itemsize

    if f_tile is None:
        TF = _pick_f_tile(Fp, Mp, TB, x_bytes, cap)
    else:
        TF = int(f_tile)
        assert TF % 128 == 0 and Fp % TF == 0
    nb, nf = Bp // TB, Fp // TF

    # Pass 1: att = softmax/shrink(x @ W^T), F as the ("arbitrary") reduction.
    att_kernel = functools.partial(_att_kernel,
                                   shrink_thres=float(shrink_thres),
                                   valid_m=int(valid_m))
    need_a = (2 * Mp * TF * 2 + 2 * TB * TF * x_bytes + 4 * TB * Mp * 4)
    att_p = pl.pallas_call(
        att_kernel,
        out_shape=jax.ShapeDtypeStruct((Bp, Mp), jnp.float32),
        grid_spec=pltpu.PrefetchScalarGridSpec(
            num_scalar_prefetch=0,
            grid=(nb, nf),
            in_specs=[
                pl.BlockSpec((TB, TF), lambda b, f: (b, f)),   # x tile
                pl.BlockSpec((Mp, TF), lambda b, f: (0, f)),   # weight F tile
            ],
            out_specs=pl.BlockSpec((TB, Mp), lambda b, f: (b, 0)),
            scratch_shapes=[pltpu.VMEM((TB, Mp), jnp.float32)],
        ),
        compiler_params=pltpu.CompilerParams(
            dimension_semantics=("parallel", "arbitrary"),
            vmem_limit_bytes=_vmem_limit(need_a, cap)),
        cost_estimate=pl.CostEstimate(
            flops=int(2 * Bp * Mp * Fp),
            transcendentals=int(Bp * Mp),
            bytes_accessed=int(Bp * Fp * x_bytes + nb * Mp * Fp * 2
                               + Bp * Mp * 4)),
    )(x2d, w_p)

    # Pass 2: out = att @ W, F tiled; the M contraction stays resident.
    need_b = (2 * Mp * TF * 2 + 2 * TB * Mp * 4 + 2 * TB * TF * out_bytes)
    out_p = pl.pallas_call(
        _recon_kernel,
        out_shape=jax.ShapeDtypeStruct((Bp, Fp), out_dtype),
        grid_spec=pltpu.PrefetchScalarGridSpec(
            num_scalar_prefetch=0,
            grid=(nb, nf),
            in_specs=[
                pl.BlockSpec((TB, Mp), lambda b, f: (b, 0)),   # att (resident)
                pl.BlockSpec((Mp, TF), lambda b, f: (0, f)),   # weight F tile
            ],
            out_specs=pl.BlockSpec((TB, TF), lambda b, f: (b, f)),
        ),
        compiler_params=pltpu.CompilerParams(
            dimension_semantics=("parallel", "arbitrary"),
            vmem_limit_bytes=_vmem_limit(need_b, cap)),
        cost_estimate=pl.CostEstimate(
            flops=int(2 * Bp * Mp * Fp),
            transcendentals=0,
            bytes_accessed=int(Bp * Mp * 4 + nb * Mp * Fp * 2
                               + Bp * Fp * out_bytes)),
    )(att_p, w_p)

    return out_p, att_p


# ---------------------------------------------------------------------------
# Public API
# ---------------------------------------------------------------------------

def prepare_memmodule_weight(weight):
    """Pad (M, F) memory to lane-dense multiples of 128 and cast to bf16.
    Do this ONCE per weight; a per-call pad+cast is an extra full HBM pass
    around a memory-bound kernel."""
    M, Fdim = weight.shape
    Mp, Fp = _round_up(M, 128), _round_up(Fdim, 128)
    w = weight
    if (Mp, Fp) != (M, Fdim):
        w = jnp.pad(w, ((0, Mp - M), (0, Fp - Fdim)))
    return w.astype(jnp.bfloat16)


def _forward_impl(x, w_p, mem_dim, fea_dim, shrink_thres, *,
                  batch_tile=None, f_tile=None, force_f_tiling=False,
                  out_dtype=jnp.float32):
    B, C, L = x.shape
    if C * L != fea_dim:
        raise ValueError("x feature size does not match the memory weight")
    Mp, Fp = w_p.shape

    cap = _vmem_capacity_bytes()
    if batch_tile is None:
        # 128 MiB-class parts (v5e/v6e) take taller LHS panels; 64 MiB (v7x)
        # keeps the working set tighter.  (v5e users may prefer 128.)
        batch_tile = 512 if cap > (96 << 20) else 256
    TB, Bp = _pick_batch_tile(B, batch_tile)

    x2d = x.reshape(B, fea_dim)
    if Bp != B or Fp != fea_dim:
        # A wrapper pad pass is unavoidable here, so fold the bf16 cast into
        # it.  When no padding is needed we pass f32 straight through and
        # cast after the VMEM load instead (no extra HBM pass).
        x2d = jnp.pad(x2d, ((0, Bp - B), (0, Fp - fea_dim))
                      ).astype(jnp.bfloat16)
    x_bytes = jnp.dtype(x2d.dtype).itemsize
    out_bytes = jnp.dtype(out_dtype).itemsize

    # Fused-path working set: single-buffered resident weight + double-
    # buffered x/out/att tiles + in-kernel logits/exp temporaries.
    fused_need = (Mp * Fp * 2
                  + 2 * TB * Fp * x_bytes
                  + 2 * TB * Fp * out_bytes
                  + 2 * TB * Mp * 4
                  + 2 * TB * Mp * 4)
    use_fused = (not force_f_tiling) and \
        (fused_need + (8 << 20) <= int(0.9 * cap))

    if use_fused:
        out_p, att_p = _fused_call(x2d, w_p, TB, out_dtype, shrink_thres,
                                   mem_dim, cap, fused_need)
    else:
        out_p, att_p = _tiled_call(x2d, w_p, TB, out_dtype, shrink_thres,
                                   mem_dim, cap, f_tile)

    out = out_p[:B, :fea_dim].reshape(B, C, L)
    att = att_p[:B, :mem_dim]
    return out, att


def mem_module_forward(x, weight, shrink_thres=0.05, *, batch_tile=None,
                       f_tile=None, force_f_tiling=False,
                       out_dtype=jnp.float32):
    """One-shot API: x (B, C, L) f32, weight (M, C*L) f32 -> (out, att).
    For repeated calls prefer MemModulePallas (weight prep hoisted)."""
    M, Fdim = weight.shape
    w_p = prepare_memmodule_weight(weight)
    return _forward_impl(x, w_p, M, Fdim, shrink_thres,
                         batch_tile=batch_tile, f_tile=f_tile,
                         force_f_tiling=force_f_tiling, out_dtype=out_dtype)


class MemModulePallas:
    """MemModule with the padded bf16 weight prepared once at construction."""

    def __init__(self, weight, shrink_thres=0.05, *, batch_tile=None,
                 f_tile=None, force_f_tiling=False, out_dtype=jnp.float32):
        self.mem_dim, self.fea_dim = weight.shape
        self.w_p = prepare_memmodule_weight(weight)
        self._fwd = jax.jit(functools.partial(
            _forward_impl,
            mem_dim=self.mem_dim, fea_dim=self.fea_dim,
            shrink_thres=float(shrink_thres), batch_tile=batch_tile,
            f_tile=f_tile, force_f_tiling=force_f_tiling,
            out_dtype=out_dtype))

    def __call__(self, x):
        return self._fwd(x, self.w_p)


# ---------------------------------------------------------------------------
# Pure-JAX reference (mirrors the PyTorch module; matmul operands in the
# kernel's bf16 MXU precision, f32 accumulation / elementwise)
# ---------------------------------------------------------------------------

def _reference(x, weight, shrink_thres=0.05, matmul_dtype=jnp.bfloat16):
    B = x.shape[0]
    xf = x.reshape(B, -1).astype(matmul_dtype)
    w = weight.astype(matmul_dtype)
    logits = jnp.dot(xf, w.T, preferred_element_type=jnp.float32)
    att = jax.nn.softmax(logits, axis=1)
    if shrink_thres > 0:
        sh = att - shrink_thres
        att = jnp.maximum(sh, 0.0) * att / (jnp.abs(sh) + 1e-12)
        att = att / jnp.maximum(jnp.sum(jnp.abs(att), axis=1, keepdims=True),
                                1e-12)
    out = jnp.dot(att.astype(matmul_dtype), w,
                  preferred_element_type=jnp.float32)
    return out.reshape(x.shape), att


if __name__ == "__main__":
    key = jax.random.PRNGKey(0)

    # --- Case 1: fused path (resident weight), module-scale demo shapes ---
    B, C, L = 2, 4, 16            # fea_dim = 64
    MEM_DIM, SHRINK = 32, 0.05
    kx, kw = jax.random.split(key)
    x = jax.random.normal(kx, (B, C, L), dtype=jnp.float32)
    weight = jax.random.normal(kw, (MEM_DIM, C * L), dtype=jnp.float32)

    mod = MemModulePallas(weight, SHRINK)
    out, att = mod(x)
    out = jax.block_until_ready(out)
    att = jax.block_until_ready(att)

    out_ref, att_ref = _reference(x, weight, SHRINK)
    assert out.shape == (B, C, L) and att.shape == (B, MEM_DIM)
    assert bool(jnp.all(jnp.isfinite(out))) and bool(jnp.all(jnp.isfinite(att)))
    assert jnp.allclose(att, att_ref, atol=2e-2, rtol=2e-2)
    assert jnp.allclose(out, out_ref, atol=2e-2, rtol=2e-2)

    # --- Case 2: F-tiled two-pass path (large-weight / v7x fit fallback),
    #     multiple batch and F grid steps, MemoryUnit's default threshold. ---
    B2, C2, L2 = 20, 4, 64        # fea_dim = 256
    MEM2, SHRINK2 = 48, 0.0025
    kx2, kw2 = jax.random.split(kw)
    x2 = jax.random.normal(kx2, (B2, C2, L2), dtype=jnp.float32)
    w2 = jax.random.normal(kw2, (MEM2, C2 * L2), dtype=jnp.float32)

    out2, att2 = mem_module_forward(x2, w2, SHRINK2, batch_tile=8,
                                    f_tile=128, force_f_tiling=True)
    out2 = jax.block_until_ready(out2)
    att2 = jax.block_until_ready(att2)

    out2_ref, att2_ref = _reference(x2, w2, SHRINK2)
    assert out2.shape == (B2, C2, L2) and att2.shape == (B2, MEM2)
    assert bool(jnp.all(jnp.isfinite(out2))) and bool(jnp.all(jnp.isfinite(att2)))
    assert jnp.allclose(att2, att2_ref, atol=2e-2, rtol=2e-2)
    assert jnp.allclose(out2, out2_ref, atol=2e-2, rtol=2e-2)

    print("KERNEL_OK")
</pallas_src>

<mosaic_0001>
module attributes {stable_mosaic.version = 11 : i64} {
  func.func @_fused_kernel(%arg0: i32, %arg1: memref<8x128xbf16, #tpu.memory_space<vmem>>, %arg2: memref<128x128xbf16, #tpu.memory_space<vmem>>, %arg3: memref<8x128xf32, #tpu.memory_space<vmem>>, %arg4: memref<8x128xf32, #tpu.memory_space<vmem>>) attributes {dimension_semantics = [#tpu.dimension_semantics<parallel>], iteration_bounds = array<i64: 1>, scalar_prefetch = 0 : i64, scratch_operands = 0 : i64, tpu.core_type = #tpu.core_type<tc>, window_params = [{transform_indices = @transform_0, window_bounds = array<i64: 8, 128>}, {pipeline_mode = #tpu.pipeline_mode<synchronous>, transform_indices = @transform_1, window_bounds = array<i64: 128, 128>}, {transform_indices = @transform_2, window_bounds = array<i64: 8, 128>}, {transform_indices = @transform_3, window_bounds = array<i64: 8, 128>}]} {
    %c0 = arith.constant 0 : index
    %c0_0 = arith.constant 0 : index
    %0 = vector.load %arg1[%c0, %c0_0] : memref<8x128xbf16, #tpu.memory_space<vmem>>, vector<8x128xbf16>
    %c0_1 = arith.constant 0 : index
    %c0_2 = arith.constant 0 : index
    %1 = vector.load %arg2[%c0_1, %c0_2] : memref<128x128xbf16, #tpu.memory_space<vmem>>, vector<128x128xbf16>
    %cst = arith.constant dense<0.000000e+00> : vector<8x128xf32>
    %2 = tpu.matmul %0, %1, %cst {dimension_numbers = #tpu.dot_dimension_numbers<[1], [1], [0], [0], [0, 0, 1, 0], [], []>} : vector<8x128xbf16>, vector<128x128xbf16>, vector<8x128xf32> -> vector<8x128xf32>
    %3 = tpu.iota {dimensions = array<i32: 1>} : vector<8x128xi32>
    %c32_i32 = arith.constant 32 : i32
    %4 = vector.broadcast %c32_i32 : i32 to vector<8x128xi32>
    %5 = arith.cmpi slt, %3, %4 : vector<8x128xi32>
    %cst_3 = arith.constant -1.000000e+30 : f32
    %6 = vector.broadcast %cst_3 : f32 to vector<8x128xf32>
    %7 = arith.select %5, %2, %6 : vector<8x128xi1>, vector<8x128xf32>
    %cst_4 = arith.constant dense<0xFF800000> : vector<8xf32>
    %8 = vector.multi_reduction <maximumf>, %7, %cst_4 [1] : vector<8x128xf32> to vector<8xf32>
    %9 = vector.shape_cast %8 : vector<8xf32> to vector<8x1xf32>
    %10 = vector.broadcast %9 : vector<8x1xf32> to vector<8x128xf32>
    %11 = arith.subf %7, %10 : vector<8x128xf32>
    %12 = math.exp %11 : vector<8x128xf32>
    %cst_5 = arith.constant dense<0.000000e+00> : vector<8xf32>
    %13 = vector.multi_reduction <add>, %12, %cst_5 [1] : vector<8x128xf32> to vector<8xf32>
    %14 = vector.shape_cast %13 : vector<8xf32> to vector<8x1xf32>
    %15 = tpu.reciprocal %14 {approx = true} : vector<8x1xf32> -> vector<8x1xf32>
    %16 = vector.broadcast %15 : vector<8x1xf32> to vector<8x128xf32>
    %17 = arith.mulf %12, %16 : vector<8x128xf32>
    %cst_6 = arith.constant 5.000000e-02 : f32
    %18 = vector.broadcast %cst_6 : f32 to vector<8x128xf32>
    %19 = arith.cmpf ogt, %17, %18 : vector<8x128xf32>
    %cst_7 = arith.constant 0.000000e+00 : f32
    %20 = vector.broadcast %cst_7 : f32 to vector<8x128xf32>
    %21 = arith.select %19, %17, %20 : vector<8x128xi1>, vector<8x128xf32>
    %cst_8 = arith.constant dense<0.000000e+00> : vector<8xf32>
    %22 = vector.multi_reduction <add>, %21, %cst_8 [1] : vector<8x128xf32> to vector<8xf32>
    %23 = vector.shape_cast %22 : vector<8xf32> to vector<8x1xf32>
    %cst_9 = arith.constant 9.99999996E-13 : f32
    %24 = vector.broadcast %cst_9 : f32 to vector<8x1xf32>
    %25 = arith.maximumf %23, %24 : vector<8x1xf32>
    %26 = tpu.reciprocal %25 {approx = true} : vector<8x1xf32> -> vector<8x1xf32>
    %27 = vector.broadcast %26 : vector<8x1xf32> to vector<8x128xf32>
    %28 = arith.mulf %21, %27 : vector<8x128xf32>
    %c0_10 = arith.constant 0 : index
    %c0_11 = arith.constant 0 : index
    %29 = vector.load %arg4[%c0_10, %c0_11] : memref<8x128xf32, #tpu.memory_space<vmem>>, vector<8x128xf32>
    tpu.vector_store %arg4[%c0_10, %c0_11], %28 {strides = array<i32>} : memref<8x128xf32, #tpu.memory_space<vmem>>, vector<8x128xf32>,
    %30 = arith.truncf %28 : vector<8x128xf32> to vector<8x128xbf16>
    %cst_12 = arith.constant dense<0.000000e+00> : vector<8x128xf32>
    %31 = tpu.matmul %30, %1, %cst_12 {dimension_numbers = #tpu.dot_dimension_numbers<[1], [0], [0], [1], [0, 0, 1, 1], [], []>} : vector<8x128xbf16>, vector<128x128xbf16>, vector<8x128xf32> -> vector<8x128xf32>
    %c0_13 = arith.constant 0 : index
    %c0_14 = arith.constant 0 : index
    %32 = vector.load %arg3[%c0_13, %c0_14] : memref<8x128xf32, #tpu.memory_space<vmem>>, vector<8x128xf32>
    tpu.vector_store %arg3[%c0_13, %c0_14], %31 {strides = array<i32>} : memref<8x128xf32, #tpu.memory_space<vmem>>, vector<8x128xf32>,
    return
  }
  func.func @transform_0(%arg0: i32) -> (i32, i32) {
    %c0_i32 = arith.constant 0 : i32
    %c0_i32_0 = arith.constant 0 : i32
    return %arg0, %c0_i32 : i32, i32
  }
  func.func @transform_1(%arg0: i32) -> (i32, i32) {
    %c0_i32 = arith.constant 0 : i32
    %c0_i32_0 = arith.constant 0 : i32
    %c0_i32_1 = arith.constant 0 : i32
    return %c0_i32, %c0_i32_0 : i32, i32
  }
  func.func @transform_2(%arg0: i32) -> (i32, i32) {
    %c0_i32 = arith.constant 0 : i32
    %c0_i32_0 = arith.constant 0 : i32
    return %arg0, %c0_i32 : i32, i32
  }
  func.func @transform_3(%arg0: i32) -> (i32, i32) {
    %c0_i32 = arith.constant 0 : i32
    %c0_i32_0 = arith.constant 0 : i32
    return %arg0, %c0_i32 : i32, i32
  }
}

</mosaic_0001>

<bundles_post_ra>
// kernel: _forward_impl.1
= control target key start
LH: loop header
LB: loop body
LE: loop exit
PB: predicated region body
PF: predicated region fallthrough
CT: control target
= control target key end

     0   :  { %9 = vsyncpa [#allocation3], 0  ;;  %s314_s12 = smov [#allocation2]   ;;  %s360_s0 = inlined_call_operand.vmem [shape: bf16[8,128], index: 0, kind: input, shape index: {}]   ;;  %s361_s1 = inlined_call_operand.hbm [shape: bf16[128,128], index: 1, kind: input, shape index: {}]   ;;  %s362_s2 = inlined_call_operand.vmem [shape: f32[8,128], index: 2, kind: output, shape index: {0}]   ;;  %s363_s3 = inlined_call_operand.vmem [shape: f32[8,128], index: 3, kind: output, shape index: {1}]  }
   0x1   :  { %s17_s13 = sshll.u32 %s314_s12, 4  ;;  %s290_s16 = scalar_lea.hbm %s361_s1, 1024  ;;  %s18_s13 = int_to_ptr.vmem [resolvable:$true] %s17_s13 }
   0x2   :  { %p291_p0 = scmp.ne.s32.totalorder %s361_s1, %s290_s16  ;;  %p294_p1 = scmp.lt.u32.totalorder %s290_s16, %s361_s1 }
   0x4   :  { %p296_p2 = pnand %p294_p1, %p291_p0 }
   0x6   :  { %299 = shalt.err (!%p296_p2)
}
   0x7   :  { %s300_s21 = scalar_lea.vmem %s18_s13, 1024  ;;  %p305_p4 = scmp.lt.s32.totalorder %s18_s13, %s18_s13 }
   0x8   :  { %p301_p3 = scmp.ne.s32.totalorder %s18_s13, %s300_s21  ;;  %p306_p5 = scmp.lt.s32.totalorder %s300_s21, %s300_s21 }
   0xa   :  { %p307_p6 = por %p306_p5, %p305_p4 }
   0xc   :  { %p308_p7 = pnand %p307_p6, %p301_p3 }
   0xe   :  { %311 = shalt.err (!%p308_p7)
}
   0xf   :  { %s315_s22 = smov 64   ;;  %s316_s23 = smov 4  }
  0x10   :  { %23 = dma.hbm_to_vmem [thread:$0]  %s361_s1, 1024, %s18_s13, [#allocation3], %s315_s22, %s315_s22, %s316_s23  }
  0x11   :  { %312 = dma.done.wait [#allocation3], 1024  }
  0x12   :  { %313 = vsyncadd [#allocation3], 4294966272  ;;  %v317_v0 = vmov 0.0   ;;  %vm318_vm0 = vmmov 0   ;;  %v276_v1 = vld [vmem:[#allocation2] sm:$0xff]   ;;  %v277_v2 = vld [vmem:[#allocation2 + $0x8] sm:$0xff]   ;;  %v133_v10 = vlaneseq }
  0x13   :  { %231 = vmatprep.subr.bf16.mxu0 %v317_v0  ;;  %247 = vmatprep.mubr.msk.bf16.mxu0 %vm318_vm0, %v317_v0  ;;  %v278_v3 = vld [vmem:[#allocation2 + $0x10] sm:$0xff]   ;;  %v279_v4 = vld [vmem:[#allocation2 + $0x18] sm:$0xff]   ;;  %v280_v5 = vld [vmem:[#allocation2 + $0x20] sm:$0xff]  }
  0x14   :  { %251 = vmatprep.subr.bf16.mxu1 %v317_v0  ;;  %267 = vmatprep.mubr.msk.bf16.mxu1 %vm318_vm0, %v317_v0  ;;  %v281_v6 = vld [vmem:[#allocation2 + $0x28] sm:$0xff]   ;;  %v282_v7 = vld [vmem:[#allocation2 + $0x30] sm:$0xff]   ;;  %v283_v8 = vld [vmem:[#allocation2 + $0x38] sm:$0xff]   ;;  %v134_v11 = vand.u32 127, %v133_v10 }
  0x15   :  { %232 = vmatpush3.bf16.xpose.msra.mxu0 %v276_v1  ;;  %252 = vmatpush3.bf16.msra.mxu1 %v276_v1  ;;  %v28_v9 = vld [vmem:[%s360_s0] sm:$0xf] }
  0x16   :  { %233 = vmatprep.subr.bf16.mxu0 %v317_v0  ;;  %253 = vmatprep.subr.bf16.mxu1 %v317_v0  ;;  %vm135_vm1 = vcmp.lt.s32.totalorder %v134_v11, 32 }
  0x19   :  { %254 = vmatpush3.bf16.msra.mxu1 %v277_v2 }
  0x1a   :  { %255 = vmatprep.subr.bf16.mxu1 %v317_v0 }
  0x1d   :  { %234 = vmatpush3.bf16.xpose.msra.mxu0 %v277_v2  ;;  %256 = vmatpush3.bf16.msra.mxu1 %v278_v3 }
  0x1e   :  { %235 = vmatprep.subr.bf16.mxu0 %v317_v0  ;;  %257 = vmatprep.subr.bf16.mxu1 %v317_v0 }
  0x21   :  { %258 = vmatpush3.bf16.msra.mxu1 %v279_v4 }
  0x22   :  { %259 = vmatprep.subr.bf16.mxu1 %v317_v0 }
  0x25   :  { %236 = vmatpush3.bf16.xpose.msra.mxu0 %v278_v3  ;;  %260 = vmatpush3.bf16.msra.mxu1 %v280_v5 }
  0x26   :  { %237 = vmatprep.subr.bf16.mxu0 %v317_v0  ;;  %261 = vmatprep.subr.bf16.mxu1 %v317_v0 }
  0x29   :  { %262 = vmatpush3.bf16.msra.mxu1 %v281_v6 }
  0x2a   :  { %263 = vmatprep.subr.bf16.mxu1 %v317_v0 }
  0x2d   :  { %238 = vmatpush3.bf16.xpose.msra.mxu0 %v279_v4  ;;  %264 = vmatpush3.bf16.msra.mxu1 %v282_v7 }
  0x2e   :  { %239 = vmatprep.subr.bf16.mxu0 %v317_v0  ;;  %265 = vmatprep.subr.bf16.mxu1 %v317_v0 }
  0x31   :  { %266 = vmatpush3.bf16.msra.mxu1 %v283_v8 }
  0x35   :  { %240 = vmatpush3.bf16.xpose.msra.mxu0 %v280_v5 }
  0x36   :  { %241 = vmatprep.subr.bf16.mxu0 %v317_v0 }
  0x3d   :  { %242 = vmatpush3.bf16.xpose.msra.mxu0 %v281_v6 }
  0x3e   :  { %243 = vmatprep.subr.bf16.mxu0 %v317_v0 }
  0x45   :  { %244 = vmatpush3.bf16.xpose.msra.mxu0 %v282_v7 }
  0x46   :  { %245 = vmatprep.subr.bf16.mxu0 %v317_v0 }
  0x4d   :  { %246 = vmatpush3.bf16.xpose.msra.mxu0 %v283_v8 }
  0x54   :  { %248 = vmatmul.mubr.bf16.vlgmr.msra.gmra.mrb[0].mxu0 %v28_v9 }
 0x127   :  { %v127_v12 = vpop.f32.mrb[0].mxu0 }
 0x128   :  { %v249_v13 = vpop.f32.mrb[1].mxu0  ;;  %v136_v14 = vsel %vm135_vm1, %v127_v12, -1e+30 }
 0x129   :  { %137 = vmax.xlane.f32.xlu0 %v136_v14  ;;  %v130_v15 = vpop.f32.mrb[2].mxu0 }
 0x12a   :  { %v250_v16 = vpop.f32.mrb[3].mxu0 }
 0x1b6   :  { %v138_v17 = vpop.xlane.xlu0 %137 }
 0x1b7   :  { %v139_v18 = vsub.f32 %v136_v14, %v138_v17 }
 0x1b9   :  { %v140_v19 = vmul.f32 1.442695, %v139_v18 }
 0x1bb   :  { %284 = vpow2.f32 %v140_v19 }
 0x1c5   :  { %v285_v20 = vpop.eup %284 }
 0x1c6   :  { %142 = vadd.xlane.f32.xlu0 %v285_v20 }
 0x253   :  { %v143_v21 = vpop.xlane.xlu0 %142 }
 0x254   :  { %286 = vrcp.f32 %v143_v21 }
 0x25e   :  { %v287_v22 = vpop.eup %286 }
 0x25f   :  { %v145_v23 = vmul.f32 %v287_v22, %v285_v20 }
 0x261   :  { %vm146_vm2 = vcmp.gt.f32.partialorder %v145_v23, 0.05 }
 0x262   :  { %v147_v24 = vsel %vm146_vm2, %v145_v23, 0.0 }
 0x263   :  { %148 = vadd.xlane.f32.xlu1 %v147_v24 }
 0x2f0   :  { %v149_v25 = vpop.xlane.xlu1 %148 }
 0x2f1   :  { %v150_v26 = vmax.f32 %v149_v25, 1e-12 }
 0x2f3   :  { %288 = vrcp.f32 %v150_v26 }
 0x2fd   :  { %v289_v27 = vpop.eup %288 }
 0x2fe   :  { %v152_v28 = vmul.f32 %v289_v27, %v147_v24 }
 0x300   :  { %153 = vst [vmem:[%s363_s3] sm:$0xff] %v152_v28  ;;  %v154_v29 = vpack.c.bf16 %v152_v28, %v152_v28 }
 0x302   :  { %268 = vmatmul.mubr.bf16.vlgmr.msra.gmra.mrb[0].mxu1 %v154_v29 }
 0x3d5   :  { %v189_v30 = vpop.f32.mrb[0].mxu1 }
 0x3d6   :  { %195 = vst [vmem:[%s362_s2] sm:$0xff] %v189_v30  ;;  %v269_v31 = vpop.f32.mrb[1].mxu1 }
 0x3d7   :  { %v192_v32 = vpop.f32.mrb[2].mxu1 }
 0x3d8   :  { %v270_v33 = vpop.f32.mrb[3].mxu1 }
 0x3d9   :  { %204 = vsyncpa [#allocation3], 1 }

</bundles_post_ra>
